<compile_context>
chip_gen: v5e
topology: v5e:2x2
jax: 0.10.0
libtpu: 0.0.40
codegen_flags: <defaults>
</compile_context>

<pallas_src>
import functools

import jax
import jax.numpy as jnp
from jax.experimental import pallas as pl
from jax.experimental.pallas import tpu as pltpu


def _kmax_kernel(x_ref, o_ref, *, k: int):
    x = x_ref[0]                                   # (L, TD), original dtype
    L, TD = x.shape

    # Compute dtype: keep bf16 work arrays when the input is bf16 (v6e/v7x native VALU),
    # f32 otherwise.  Ordering / equality tie-break semantics are identical.
    cdt = x.dtype if x.dtype == jnp.bfloat16 else jnp.float32
    work = x.astype(cdt)
    neg_inf = jnp.array(-jnp.inf, dtype=cdt)

    row = jax.lax.broadcasted_iota(jnp.int32, (L, TD), 0)
    sel = jnp.zeros((L, TD), dtype=jnp.bool_)      # kept: guards repeated -inf inputs

    # --- k-pass selection: O(k*L*TD) VALU/XLU, records the chosen row per pass ---------
    sel_rows = []
    for _ in range(k):
        m = jnp.max(work, axis=0, keepdims=True)                    # (1, TD)
        cand = (work == m) & jnp.logical_not(sel)                   # (L, TD)
        first_row = jnp.min(jnp.where(cand, row, L),
                            axis=0, keepdims=True)                  # (1, TD) int32
        first = row == first_row                                    # exactly one per column
        sel = sel | first
        work = jnp.where(first, neg_inf, work)
        sel_rows.append(first_row)

    # --- restore original order: sort the k row indices per column (bubble network) ----
    for i in range(k - 1):
        for j in range(k - 1 - i):
            a, b = sel_rows[j], sel_rows[j + 1]
            sel_rows[j] = jnp.minimum(a, b)
            sel_rows[j + 1] = jnp.maximum(a, b)

    # --- gather: k 2-D masked column sums (one hit per column -> exact) ----------------
    zero = jnp.zeros((), x.dtype)
    outs = [
        jnp.sum(jnp.where(row == sel_rows[j], x, zero), axis=0, keepdims=True)  # (1, TD)
        for j in range(k)
    ]
    o_ref[0] = jnp.concatenate(outs, axis=0).astype(o_ref.dtype)    # (k, TD)


def _vmem_capacity_bytes() -> int:
    """Best-effort physical VMEM capacity query; conservative (v7x) fallback."""
    try:
        info = pltpu.get_tpu_info()
        for attr in ("vmem_capacity_bytes", "vmem_size_bytes"):
            cap = getattr(info, attr, None)
            if cap:
                return int(cap)
    except Exception:
        pass
    return 64 * 1024 * 1024


def _pick_feature_tile(D: int, L: int, in_itemsize: int, compute_itemsize: int,
                       k: int, budget_bytes: int) -> int:
    """Largest lane-dense (multiple-of-128) feature tile whose working set fits budget."""
    if D % 128 != 0:
        return D                     # full-dim block satisfies the (8,128) layout rule

    def est(td: int) -> int:
        # 2x double-buffered input/output tiles + work/iota/mask (L, td) planes.
        io = 2 * L * td * in_itemsize + 2 * k * td * in_itemsize
        planes = L * td * (compute_itemsize + 12)   # work + int32 iota + bool + temp
        return io + planes

    cands = sorted({td for td in (1024, 512, 384, 256, 128, D)
                    if D % td == 0 and td % 128 == 0}, reverse=True)
    for td in cands:
        if est(td) <= budget_bytes:
            return td
    return cands[-1]                 # best effort: smallest lane-dense tile


def kmax_pooling_1d(x: jax.Array, k: int) -> jax.Array:
    """k-max pooling along axis 1, preserving original order. x: (B, L, D) -> (B, k, D)."""
    B, L, D = x.shape
    if L < k:
        # matches the PyTorch module's NotImplementedError branch
        raise NotImplementedError("size along dim=1 must be >= k")

    cap = _vmem_capacity_bytes()
    budget = min(cap // 2, 48 * 1024 * 1024)
    in_itemsize = jnp.dtype(x.dtype).itemsize
    compute_itemsize = 2 if x.dtype == jnp.bfloat16 else 4
    td = _pick_feature_tile(D, L, in_itemsize, compute_itemsize, k, budget)

    # v7x has 2 TensorCores: make sure there are >= 2 "parallel" programs when possible.
    if B * (D // td) < 2 and td % 256 == 0:
        td //= 2

    vmem_limit = int(min(cap, 2 * budget))

    kernel = functools.partial(_kmax_kernel, k=k)
    return pl.pallas_call(
        kernel,
        out_shape=jax.ShapeDtypeStruct((B, k, D), x.dtype),
        grid_spec=pltpu.PrefetchScalarGridSpec(
            num_scalar_prefetch=0,
            grid=(B, D // td),
            in_specs=[pl.BlockSpec((1, L, td), lambda b, d: (b, 0, d))],
            out_specs=pl.BlockSpec((1, k, td), lambda b, d: (b, 0, d)),
        ),
        compiler_params=pltpu.CompilerParams(
            dimension_semantics=("parallel", "parallel"),
            vmem_limit_bytes=vmem_limit,
        ),
    )(x)


def _kmax_pooling_ref(x: jax.Array, k: int) -> jax.Array:
    """Pure-JAX reference mirroring the PyTorch code (topk -> sort indices -> gather)."""
    xt = jnp.transpose(x, (0, 2, 1))          # (B, D, L)
    _, idx = jax.lax.top_k(xt, k)             # (B, D, k)
    idx = jnp.sort(idx, axis=-1)
    gathered = jnp.take_along_axis(xt, idx, axis=-1)
    return jnp.transpose(gathered, (0, 2, 1))  # (B, k, D)


if __name__ == "__main__":
    B, L, D, K = 2, 8, 32, 3
    key = jax.random.PRNGKey(0)
    x = jax.random.normal(key, (B, L, D), dtype=jnp.float32)

    out = kmax_pooling_1d(x, K)
    out = jax.block_until_ready(out)

    ref = _kmax_pooling_ref(x, K)
    assert out.shape == (B, K, D), out.shape
    assert jnp.allclose(out, ref, atol=1e-6), "mismatch vs reference"

    # second check with ties to exercise the lowest-index tie-break
    x2 = jnp.round(jax.random.normal(jax.random.PRNGKey(1), (B, L, D)) * 2.0) / 2.0
    out2 = jax.block_until_ready(kmax_pooling_1d(x2, K))
    assert jnp.allclose(out2, _kmax_pooling_ref(x2, K), atol=1e-6), "tie mismatch"

    # third check: lane-dense feature dim (exercises the tiled BlockSpec path)
    x3 = jax.random.normal(jax.random.PRNGKey(2), (2, 16, 256), dtype=jnp.float32)
    out3 = jax.block_until_ready(kmax_pooling_1d(x3, 4))
    assert jnp.allclose(out3, _kmax_pooling_ref(x3, 4), atol=1e-6), "tiled mismatch"

    print("KERNEL_OK")
</pallas_src>

<mosaic_0001>
module attributes {stable_mosaic.version = 11 : i64} {
  func.func @_kmax_kernel(%arg0: i32, %arg1: i32, %arg2: memref<1x8x32xf32, #tpu.memory_space<vmem>>, %arg3: memref<1x3x32xf32, #tpu.memory_space<vmem>>) attributes {dimension_semantics = [#tpu.dimension_semantics<parallel>, #tpu.dimension_semantics<parallel>], iteration_bounds = array<i64: 2, 1>, scalar_prefetch = 0 : i64, scratch_operands = 0 : i64, tpu.core_type = #tpu.core_type<tc>, window_params = [{transform_indices = @transform_0, window_bounds = array<i64: 1, 8, 32>}, {transform_indices = @transform_1, window_bounds = array<i64: 1, 3, 32>}]} {
    %c0 = arith.constant 0 : index
    %c0_0 = arith.constant 0 : index
    %c0_1 = arith.constant 0 : index
    %0 = vector.load %arg2[%c0, %c0_0, %c0_1] : memref<1x8x32xf32, #tpu.memory_space<vmem>>, vector<1x8x32xf32>
    %1 = vector.shape_cast %0 : vector<1x8x32xf32> to vector<8x32xf32>
    %2 = tpu.iota {dimensions = array<i32: 0>} : vector<8x32xi32>
    %false = arith.constant false
    %3 = vector.broadcast %false : i1 to vector<8x32xi1>
    %cst = arith.constant dense<0xFF800000> : vector<32xf32>
    %4 = vector.multi_reduction <maximumf>, %1, %cst [0] : vector<8x32xf32> to vector<32xf32>
    %5 = vector.shape_cast %4 : vector<32xf32> to vector<1x32xf32>
    %6 = vector.broadcast %5 : vector<1x32xf32> to vector<8x32xf32>
    %7 = arith.cmpf oeq, %1, %6 : vector<8x32xf32>
    %cst_2 = arith.constant dense<true> : vector<8x32xi1>
    %8 = arith.xori %3, %cst_2 : vector<8x32xi1>
    %9 = arith.andi %7, %8 : vector<8x32xi1>
    %c8_i32 = arith.constant 8 : i32
    %10 = vector.broadcast %c8_i32 : i32 to vector<8x32xi32>
    %11 = arith.select %9, %2, %10 : vector<8x32xi1>, vector<8x32xi32>
    %cst_3 = arith.constant dense<2147483647> : vector<32xi32>
    %12 = vector.multi_reduction <minsi>, %11, %cst_3 [0] : vector<8x32xi32> to vector<32xi32>
    %13 = vector.shape_cast %12 : vector<32xi32> to vector<1x32xi32>
    %14 = vector.broadcast %13 : vector<1x32xi32> to vector<8x32xi32>
    %15 = arith.cmpi eq, %2, %14 : vector<8x32xi32>
    %16 = arith.ori %3, %15 : vector<8x32xi1>
    %cst_4 = arith.constant 0xFF800000 : f32
    %17 = vector.broadcast %cst_4 : f32 to vector<8x32xf32>
    %18 = arith.select %15, %17, %1 : vector<8x32xi1>, vector<8x32xf32>
    %cst_5 = arith.constant dense<0xFF800000> : vector<32xf32>
    %19 = vector.multi_reduction <maximumf>, %18, %cst_5 [0] : vector<8x32xf32> to vector<32xf32>
    %20 = vector.shape_cast %19 : vector<32xf32> to vector<1x32xf32>
    %21 = vector.broadcast %20 : vector<1x32xf32> to vector<8x32xf32>
    %22 = arith.cmpf oeq, %18, %21 : vector<8x32xf32>
    %cst_6 = arith.constant dense<true> : vector<8x32xi1>
    %23 = arith.xori %16, %cst_6 : vector<8x32xi1>
    %24 = arith.andi %22, %23 : vector<8x32xi1>
    %c8_i32_7 = arith.constant 8 : i32
    %25 = vector.broadcast %c8_i32_7 : i32 to vector<8x32xi32>
    %26 = arith.select %24, %2, %25 : vector<8x32xi1>, vector<8x32xi32>
    %cst_8 = arith.constant dense<2147483647> : vector<32xi32>
    %27 = vector.multi_reduction <minsi>, %26, %cst_8 [0] : vector<8x32xi32> to vector<32xi32>
    %28 = vector.shape_cast %27 : vector<32xi32> to vector<1x32xi32>
    %29 = vector.broadcast %28 : vector<1x32xi32> to vector<8x32xi32>
    %30 = arith.cmpi eq, %2, %29 : vector<8x32xi32>
    %31 = arith.ori %16, %30 : vector<8x32xi1>
    %cst_9 = arith.constant 0xFF800000 : f32
    %32 = vector.broadcast %cst_9 : f32 to vector<8x32xf32>
    %33 = arith.select %30, %32, %18 : vector<8x32xi1>, vector<8x32xf32>
    %cst_10 = arith.constant dense<0xFF800000> : vector<32xf32>
    %34 = vector.multi_reduction <maximumf>, %33, %cst_10 [0] : vector<8x32xf32> to vector<32xf32>
    %35 = vector.shape_cast %34 : vector<32xf32> to vector<1x32xf32>
    %36 = vector.broadcast %35 : vector<1x32xf32> to vector<8x32xf32>
    %37 = arith.cmpf oeq, %33, %36 : vector<8x32xf32>
    %cst_11 = arith.constant dense<true> : vector<8x32xi1>
    %38 = arith.xori %31, %cst_11 : vector<8x32xi1>
    %39 = arith.andi %37, %38 : vector<8x32xi1>
    %c8_i32_12 = arith.constant 8 : i32
    %40 = vector.broadcast %c8_i32_12 : i32 to vector<8x32xi32>
    %41 = arith.select %39, %2, %40 : vector<8x32xi1>, vector<8x32xi32>
    %cst_13 = arith.constant dense<2147483647> : vector<32xi32>
    %42 = vector.multi_reduction <minsi>, %41, %cst_13 [0] : vector<8x32xi32> to vector<32xi32>
    %43 = vector.shape_cast %42 : vector<32xi32> to vector<1x32xi32>
    %44 = arith.minsi %13, %28 : vector<1x32xi32>
    %45 = arith.maxsi %13, %28 : vector<1x32xi32>
    %46 = arith.minsi %45, %43 : vector<1x32xi32>
    %47 = arith.maxsi %45, %43 : vector<1x32xi32>
    %48 = arith.minsi %44, %46 : vector<1x32xi32>
    %49 = arith.maxsi %44, %46 : vector<1x32xi32>
    %50 = vector.broadcast %48 : vector<1x32xi32> to vector<8x32xi32>
    %51 = arith.cmpi eq, %2, %50 : vector<8x32xi32>
    %cst_14 = arith.constant 0.000000e+00 : f32
    %52 = vector.broadcast %cst_14 : f32 to vector<8x32xf32>
    %53 = arith.select %51, %1, %52 : vector<8x32xi1>, vector<8x32xf32>
    %cst_15 = arith.constant dense<0.000000e+00> : vector<32xf32>
    %54 = vector.multi_reduction <add>, %53, %cst_15 [0] : vector<8x32xf32> to vector<32xf32>
    %55 = vector.shape_cast %54 : vector<32xf32> to vector<1x32xf32>
    %56 = vector.broadcast %49 : vector<1x32xi32> to vector<8x32xi32>
    %57 = arith.cmpi eq, %2, %56 : vector<8x32xi32>
    %cst_16 = arith.constant 0.000000e+00 : f32
    %58 = vector.broadcast %cst_16 : f32 to vector<8x32xf32>
    %59 = arith.select %57, %1, %58 : vector<8x32xi1>, vector<8x32xf32>
    %cst_17 = arith.constant dense<0.000000e+00> : vector<32xf32>
    %60 = vector.multi_reduction <add>, %59, %cst_17 [0] : vector<8x32xf32> to vector<32xf32>
    %61 = vector.shape_cast %60 : vector<32xf32> to vector<1x32xf32>
    %62 = vector.broadcast %47 : vector<1x32xi32> to vector<8x32xi32>
    %63 = arith.cmpi eq, %2, %62 : vector<8x32xi32>
    %cst_18 = arith.constant 0.000000e+00 : f32
    %64 = vector.broadcast %cst_18 : f32 to vector<8x32xf32>
    %65 = arith.select %63, %1, %64 : vector<8x32xi1>, vector<8x32xf32>
    %cst_19 = arith.constant dense<0.000000e+00> : vector<32xf32>
    %66 = vector.multi_reduction <add>, %65, %cst_19 [0] : vector<8x32xf32> to vector<32xf32>
    %67 = vector.shape_cast %66 : vector<32xf32> to vector<1x32xf32>
    %68 = tpu.concatenate %55, %61, %67 in 0 : vector<1x32xf32>, vector<1x32xf32>, vector<1x32xf32> -> vector<3x32xf32>
    %c0_20 = arith.constant 0 : index
    %c0_21 = arith.constant 0 : index
    %c0_22 = arith.constant 0 : index
    %69 = vector.load %arg3[%c0_20, %c0_21, %c0_22] : memref<1x3x32xf32, #tpu.memory_space<vmem>>, vector<1x3x32xf32>
    %70 = vector.shape_cast %69 : vector<1x3x32xf32> to vector<3x32xf32>
    %71 = vector.shape_cast %68 : vector<3x32xf32> to vector<1x3x32xf32>
    tpu.vector_store %arg3[%c0_20, %c0_21, %c0_22], %71 {strides = array<i32>} : memref<1x3x32xf32, #tpu.memory_space<vmem>>, vector<1x3x32xf32>,
    return
  }
  func.func @transform_0(%arg0: i32, %arg1: i32) -> (i32, i32, i32) {
    %c0_i32 = arith.constant 0 : i32
    %c0_i32_0 = arith.constant 0 : i32
    return %arg0, %c0_i32, %arg1 : i32, i32, i32
  }
  func.func @transform_1(%arg0: i32, %arg1: i32) -> (i32, i32, i32) {
    %c0_i32 = arith.constant 0 : i32
    %c0_i32_0 = arith.constant 0 : i32
    return %arg0, %c0_i32, %arg1 : i32, i32, i32
  }
}

</mosaic_0001>

<bundles_post_ra>
// kernel: tpu_custom_call.1
= control target key start
LH: loop header
LB: loop body
LE: loop exit
PB: predicated region body
PF: predicated region fallthrough
CT: control target
= control target key end

     0   :  { %6 = vsyncpa [#allocation3], 0  ;;  %s639_s0 = inlined_call_operand.hbm [shape: f32[2,8,32], index: 0, kind: input, shape index: {}]   ;;  %s640_s1 = inlined_call_operand.vmem [shape: f32[2,3,32], index: 1, kind: output, shape index: {}]  }
   0x1   :  { %8 = vsyncpa [#allocation3 + $0x1], 0  ;;  %s516_s6 = smov 0   ;;  %s518_s7 = smov 0  }
   0x2   :  { %s520_s8 = smov 0   ;;  %s522_s9 = smov 0  }
   0x3   :  { %s524_s10 = smov 0   ;;  %s526_s11 = smov 0  }
   0x4 LB: > { %s356_s12 = sadd.s32 4294967295, %s503_s11   ;;  %s26_s13 = sadd.s32 1, %s499_s10  ;;  %s503_s11 = sphi %s526_s11, %s14_s11   ;;  %s499_s10 = sphi %s524_s10, %s647_s10   ;;  %s495_s9 = sphi %s522_s9, %s646_s9   ;;  %s491_s8 = sphi %s520_s8, %s645_s8   ;;  %s487_s7 = sphi %s518_s7, %s644_s7   ;;  %s483_s6 = sphi %s516_s6, %s643_s6  }
   0x5   : > { %p28_p0 = scmp.ge.s32.totalorder %s26_s13, 2  ;;  %s35_s14 = sadd.s32 1, %s491_s8 }
   0x6   : > { %p42_p1 = scmp.ne.s32.totalorder %s491_s8, %s487_s7  ;;  %p43_p2 = scmp.eq.s32.totalorder %s503_s11, 0 }
   0x7   : > { %s649_s13 = smov (%p28_p0, %s26_s13), 0  ;;  %p48_p4 = scmp.ne.s32.totalorder %s487_s7, %s483_s6 }
   0x8   : > { %p552_p3 = por %p43_p2, %p42_p1  ;;  %s30_s16 = ssub.s32 %s499_s10, %s649_s13 }
   0x9   : > { %p49_p5 = scmp.eq.s32.totalorder %s356_s12, 0  ;;  %p33_p6 = scmp.eq.s32.totalorder %s30_s16, 0 }
   0xa   : > { %p373_p8 = scmp.lt.s32.totalorder %s503_s11, 2  ;;  %s100_s19 = sand.u32 1, %s491_s8  }
   0xb   : > { %p559_p7 = por %p49_p5, %p48_p4  ;;  %s361_s20 = sshll.u32 %s499_s10, 3 }
   0xc   : > { %s565_s18 = scalar_select %p33_p6, %s491_s8, %s35_s14  }
   0xd   : > { %s360_s21 = sshll.u32 %s100_s19, 3  ;;  %s109_s24 = scalar_lea.hbm %s639_s0, %s361_s20 }
   0xe   : > { %s111_s25 = sshll.u32 %s109_s24, 4  ;;  %s104_s26 = scalar_lea.vmem [#allocation2], %s360_s21  ;;  %s112_s25 = int_to_ptr.hbm [resolvable:$true] %s111_s25 }
   0xf   : > { %s113_s27 = sshll.u32 %s104_s26, 4  ;;  %p370_p9 = pnand %p373_p8, %p552_p3  ;;  %s114_s27 = int_to_ptr.vmem [resolvable:$true] %s113_s27 }
  0x10   : > { %p362_p10 = scmp.ge.s32.totalorder %s503_s11, 1  ;;  %p118_p11 = scmp.lt.s32.totalorder %s503_s11, 3 }
  0x11   : > { %s101_s28 = scalar_lea.sflag [#allocation3], %s100_s19 }
  0x12   : > { %372 = dma.hbm_to_vmem [thread:$0]  (!%p370_p9), %s112_s25, 128, %s114_s27, %s101_s28  }
  0x13   : > { %p119_p12 = pnand %p362_p10, %p118_p11 }
  0x14   : > { %s124_s29 = sand.u32 (!%p119_p12), 1, %s487_s7  }
  0x15   : > { %122 = sbr.rel (%p119_p12) target bundleno = 140 (0x8c), region = 24  ;;  %s363_s30 = sshll.u32 (!%p119_p12), %s124_s29, 3 }
  0x16   : > { %s125_s2 = scalar_lea.sflag (!%p119_p12), [#allocation3], %s124_s29  ;;  %s128_s3 = scalar_lea.vmem (!%p119_p12), [#allocation2], %s363_s30 }
  0x1a   : > { %478 = dma.done.wait (%p559_p7), %s125_s2, 128  }
  0x1b   : > { %480 = vsyncadd (%p559_p7), %s125_s2, 4294967168  ;;  %vm160_vm0 = vcmask 261120   ;;  %v581_v0 = vld [vmem:[%s128_s3] sm:$0xff]  ;;  %v158_v5 = vlaneseq  ;;  %vm505_vm6 = vmmov 1   ;;  %p150_p13 = scmp.lt.s32.totalorder %s495_s9, 1 }
  0x1c   : > { %v161_v1 = vsel %vm160_vm0, %v581_v0, -inf }
  0x1d   : > { %v162_v2 = vrot.slane %v161_v1, 4  ;;  %v585_v8 = vshrl.u32 %v158_v5, 7  ;;  %s651_s9 = smov (!%p150_p13, %s495_s9), 1 }
  0x1e   : > { %s364_s4 = sshll.u32 %s651_s9, 2 }
  0x1f   : > { %v163_v3 = vmax.f32 %v161_v1, %v162_v2  ;;  %s156_s12 = scalar_lea.vmem %s640_s1, %s364_s4 }
  0x21   : > { %v164_v4 = vrot.slane %v163_v3, 2 }
  0x23   : > { %v165_v6 = vmax.f32 %v163_v3, %v164_v4 }
  0x25   : > { %v166_v7 = vrot.slane %v165_v6, 1 }
  0x27   : > { %v167_v9 = vmax.f32 %v165_v6, %v166_v7 }
  0x29   : > { %vm168_vm1 = vcmp.eq.f32.partialorder %v581_v0, %v167_v9 }
  0x2a   : > { %v169_v10 = vsel %vm168_vm1, %v585_v8, 8 }
  0x2b   : > { %v170_v11 = vsel %vm160_vm0, %v169_v10, 2147483647 }
  0x2c   : > { %v171_v12 = vrot.slane %v170_v11, 4 }
  0x2e   : > { %vm172_vm2 = vcmp.lt.s32.totalorder %v170_v11, %v171_v12 }
  0x2f   : > { %v173_v13 = vsel %vm172_vm2, %v170_v11, %v171_v12 }
  0x30   : > { %v174_v14 = vrot.slane %v173_v13, 2 }
  0x32   : > { %vm175_vm3 = vcmp.lt.s32.totalorder %v173_v13, %v174_v14 }
  0x33   : > { %v176_v15 = vsel %vm175_vm3, %v173_v13, %v174_v14 }
  0x34   : > { %v177_v16 = vrot.slane %v176_v15, 1 }
  0x36   : > { %vm178_vm4 = vcmp.lt.s32.totalorder %v176_v15, %v177_v16 }
  0x37   : > { %v179_v17 = vsel %vm178_vm4, %v176_v15, %v177_v16 }
  0x38   : > { %vm180_vm5 = vcmp.eq.s32.totalorder %v585_v8, %v179_v17 }
  0x39   : > { %v181_v18 = vsel %vm180_vm5, -inf, %v581_v0  ;;  %vm190_vm7 = vmxor %vm180_vm5, %vm505_vm6 }
  0x3a   : > { %v182_v19 = vsel %vm160_vm0, %v181_v18, -inf }
  0x3b   : > { %v183_v20 = vrot.slane %v182_v19, 4 }
  0x3d   : > { %v184_v21 = vmax.f32 %v182_v19, %v183_v20 }
  0x3f   : > { %v185_v22 = vrot.slane %v184_v21, 2 }
  0x41   : > { %v186_v23 = vmax.f32 %v184_v21, %v185_v22 }
  0x43   : > { %v187_v24 = vrot.slane %v186_v23, 1 }
  0x45   : > { %v188_v25 = vmax.f32 %v186_v23, %v187_v24 }
  0x47   : > { %vm189_vm8 = vcmp.eq.f32.partialorder %v181_v18, %v188_v25 }
  0x48   : > { %vm191_vm9 = vmand %vm189_vm8, %vm190_vm7 }
  0x49   : > { %v192_v26 = vsel %vm191_vm9, %v585_v8, 8 }
  0x4a   : > { %v193_v27 = vsel %vm160_vm0, %v192_v26, 2147483647 }
  0x4b   : > { %v194_v28 = vrot.slane %v193_v27, 4 }
  0x4d   : > { %vm195_vm10 = vcmp.lt.s32.totalorder %v193_v27, %v194_v28 }
  0x4e   : > { %v196_v29 = vsel %vm195_vm10, %v193_v27, %v194_v28 }
  0x4f   : > { %v197_v30 = vrot.slane %v196_v29, 2 }
  0x51   : > { %vm198_vm11 = vcmp.lt.s32.totalorder %v196_v29, %v197_v30 }
  0x52   : > { %v199_v31 = vsel %vm198_vm11, %v196_v29, %v197_v30 }
  0x53   : > { %v200_v32 = vrot.slane %v199_v31, 1 }
  0x55   : > { %vm201_vm12 = vcmp.lt.s32.totalorder %v199_v31, %v200_v32 }
  0x56   : > { %v202_v33 = vsel %vm201_vm12, %v199_v31, %v200_v32 }
  0x57   : > { %vm203_vm13 = vcmp.eq.s32.totalorder %v585_v8, %v202_v33  ;;  %vm229_vm7 = vcmp.gt.s32.totalorder %v179_v17, %v202_v33  ;;  %vm227_vm8 = vcmp.lt.s32.totalorder %v179_v17, %v202_v33 }
  0x58   : > { %v205_v34 = vsel %vm203_vm13, -inf, %v181_v18  ;;  %vm204_vm14 = vmor %vm180_vm5, %vm203_vm13  ;;  %v230_v49 = vsel %vm229_vm7, %v179_v17, %v202_v33  ;;  %v228_v51 = vsel %vm227_vm8, %v179_v17, %v202_v33 }
  0x59   : > { %v206_v35 = vsel %vm160_vm0, %v205_v34, -inf  ;;  %vm214_vm15 = vmxor %vm204_vm14, %vm505_vm6 }
  0x5a   : > { %v207_v36 = vrot.slane %v206_v35, 4 }
  0x5c   : > { %v208_v37 = vmax.f32 %v206_v35, %v207_v36 }
  0x5e   : > { %v209_v38 = vrot.slane %v208_v37, 2 }
  0x60   : > { %v210_v39 = vmax.f32 %v208_v37, %v209_v38 }
  0x62   : > { %v211_v40 = vrot.slane %v210_v39, 1 }
  0x64   : > { %v212_v41 = vmax.f32 %v210_v39, %v211_v40 }
  0x66   : > { %vm213_vm1 = vcmp.eq.f32.partialorder %v205_v34, %v212_v41 }
  0x67   : > { %vm215_vm2 = vmand %vm213_vm1, %vm214_vm15  ;;  %vm266_vm15 = vcmask 1040384   ;;  %vm270_vm1 = vcmask 256000  }
  0x68   : > { %v216_v42 = vsel %vm215_vm2, %v585_v8, 8 }
  0x69   : > { %v217_v43 = vsel %vm160_vm0, %v216_v42, 2147483647 }
  0x6a   : > { %v218_v44 = vrot.slane %v217_v43, 4 }
  0x6c   : > { %vm219_vm3 = vcmp.lt.s32.totalorder %v217_v43, %v218_v44 }
  0x6d   : > { %v220_v45 = vsel %vm219_vm3, %v217_v43, %v218_v44 }
  0x6e   : > { %v221_v46 = vrot.slane %v220_v45, 2 }
  0x70   : > { %vm222_vm4 = vcmp.lt.s32.totalorder %v220_v45, %v221_v46 }
  0x71   : > { %v223_v47 = vsel %vm222_vm4, %v220_v45, %v221_v46 }
  0x72   : > { %v224_v48 = vrot.slane %v223_v47, 1 }
  0x74   : > { %vm225_vm5 = vcmp.lt.s32.totalorder %v223_v47, %v224_v48 }
  0x75   : > { %v226_v50 = vsel %vm225_vm5, %v223_v47, %v224_v48 }
  0x76   : > { %vm231_vm6 = vcmp.lt.s32.totalorder %v230_v49, %v226_v50  ;;  %vm233_vm9 = vcmp.gt.s32.totalorder %v230_v49, %v226_v50 }
  0x77   : > { %v232_v52 = vsel %vm231_vm6, %v230_v49, %v226_v50  ;;  %v234_v53 = vsel %vm233_vm9, %v230_v49, %v226_v50 }
  0x78   : > { %vm235_vm10 = vcmp.lt.s32.totalorder %v228_v51, %v232_v52  ;;  %vm237_vm11 = vcmp.gt.s32.totalorder %v228_v51, %v232_v52  ;;  %vm257_vm12 = vcmp.eq.s32.totalorder %v585_v8, %v234_v53 }
  0x79   : > { %v236_v54 = vsel %vm235_vm10, %v228_v51, %v232_v52  ;;  %v238_v55 = vsel %vm237_vm11, %v228_v51, %v232_v52  ;;  %v258_v56 = vsel %vm257_vm12, %v581_v0, 0.0 }
  0x7a   : > { %vm239_vm13 = vcmp.eq.s32.totalorder %v585_v8, %v236_v54  ;;  %vm248_vm14 = vcmp.eq.s32.totalorder %v585_v8, %v238_v55  ;;  %v259_v57 = vsel %vm160_vm0, %v258_v56, 0.0 }
  0x7b   : > { %v240_v58 = vsel %vm239_vm13, %v581_v0, 0.0  ;;  %v249_v59 = vsel %vm248_vm14, %v581_v0, 0.0  ;;  %v260_v60 = vrot.slane %v259_v57, 4 }
  0x7c   : > { %v241_v61 = vsel %vm160_vm0, %v240_v58, 0.0  ;;  %v250_v62 = vsel %vm160_vm0, %v249_v59, 0.0  ;;  %vm268_vm0 = vcmask 1041408  }
  0x7d   : > { %v242_v63 = vrot.slane %v241_v61, 4  ;;  %v251_v1 = vrot.slane %v250_v62, 4  ;;  %v261_v2 = vadd.f32 %v260_v60, %v259_v57 }
  0x7f   : > { %v243_v3 = vadd.f32 %v242_v63, %v241_v61  ;;  %v252_v4 = vadd.f32 %v251_v1, %v250_v62  ;;  %v262_v5 = vrot.slane %v261_v2, 2 }
  0x81   : > { %v244_v6 = vrot.slane %v243_v3, 2  ;;  %v253_v7 = vrot.slane %v252_v4, 2  ;;  %v263_v8 = vadd.f32 %v262_v5, %v261_v2 }
  0x83   : > { %v245_v9 = vadd.f32 %v244_v6, %v243_v3  ;;  %v254_v10 = vadd.f32 %v253_v7, %v252_v4  ;;  %v264_v11 = vrot.slane %v263_v8, 1 }
  0x85   : > { %v246_v0 = vrot.slane %v245_v9, 1  ;;  %v255_v12 = vrot.slane %v254_v10, 1  ;;  %v265_v13 = vadd.f32 %v264_v11, %v263_v8 }
  0x87   : > { %v247_v14 = vadd.f32 %v246_v0, %v245_v9  ;;  %v256_v15 = vadd.f32 %v255_v12, %v254_v10 }
  0x89   : > { %v267_v16 = vsel %vm266_vm15, %v247_v14, %v256_v15 }
  0x8a   : > { %v269_v17 = vsel %vm268_vm0, %v267_v16, %v265_v13 }
  0x8b   : > { %271 = vst.msk [vmem:[%s156_s12] sm:$0x7] %vm270_vm1, %v269_v17 }
  0x8c PF: > { %s14_s11 = sadd.s32 1, %s503_s11   ;;  %s643_s6 = smov %s487_s7 }
  0x8d   : > { %p11_p0 = scmp.ge.s32.totalorder %s14_s11, 4   ;;  %s644_s7 = smov %s491_s8 }
  0x8e   : > { %s645_s8 = smov %s565_s18  ;;  %s646_s9 = smov %s499_s10 }
  0x8f   : > { %s647_s10 = smov %s649_s13  ;;  %13 = sbr.rel (!%p11_p0) target bundleno = 4 (0x4), region = 64 }
  0x94   :  { %297 = vsyncpa [#allocation3], 1 }
  0x95   :  { %299 = vsyncpa [#allocation3 + $0x1], 1 }

</bundles_post_ra>
